<compile_context>
chip_gen: v5e
topology: v5e:2x2
jax: 0.10.0
libtpu: 0.0.40
codegen_flags: <defaults>
</compile_context>

<pallas_src>
import jax
import jax.numpy as jnp
from jax.experimental import pallas as pl
from jax.experimental.pallas import tpu as pltpu

LANE = 128          # lane (last-dim) granularity
SUBLANE_BF16 = 16   # bf16 packs 16 rows per vreg
TILE_N_MAX = 512    # row tile (>=512 ~85% of HBM roofline for streamed acts)
TILE_H_MAX = 512    # hidden-dim streaming block (multiple of 128)


def _round_up(x, m):
    return (x + m - 1) // m * m


def mlp_kernel(x_ref, w1_ref, b1_ref, w2_ref, b2_ref, o_ref, acc_ref):
    """One (row-tile, hidden-tile) step of y = (x @ W1 + b1) @ W2 + b2."""
    hk = pl.program_id(1)

    @pl.when(hk == 0)
    def _():
        acc_ref[...] = jnp.zeros_like(acc_ref)

    # First GEMM over this hidden slice: [tn, Cin] bf16 @ [Cin, th] bf16 -> f32.
    h = jnp.dot(x_ref[...], w1_ref[...], preferred_element_type=jnp.float32)
    h = h + b1_ref[...]                 # f32 bias epilogue (b1 is [1, th])
    # Dropout (eval / inference mode) -> identity.
    # Cast back to bf16 so the second GEMM also uses the native bf16 MXU path.
    h = h.astype(w2_ref.dtype)
    # Second GEMM: partial contribution of this hidden slice to the output.
    acc_ref[...] += jnp.dot(h, w2_ref[...], preferred_element_type=jnp.float32)

    @pl.when(hk == pl.num_programs(1) - 1)
    def _():
        o_ref[...] = (acc_ref[...] + b2_ref[...]).astype(o_ref.dtype)


def prepare_params(w1, b1, w2, b2):
    """Pad + cast parameters once (hoisted out of the per-call path).

    w1: [Cin, H] (= torch W1^T), b1: [H] or [1, H]
    w2: [H, Cout] (= torch W2^T), b2: [Cout] or [1, Cout]
    Zero padding does not change the linear-layer result.
    """
    Cin, H = w1.shape
    Cout = w2.shape[1]

    Cin_p = _round_up(Cin, LANE)
    Cout_p = _round_up(Cout, LANE)
    H_128 = _round_up(H, LANE)
    tile_h = H_128 if H_128 <= TILE_H_MAX else TILE_H_MAX
    H_p = _round_up(H, tile_h)

    b1 = jnp.reshape(b1, (1, -1))
    b2 = jnp.reshape(b2, (1, -1))

    w1p = jnp.zeros((Cin_p, H_p), jnp.bfloat16).at[:Cin, :H].set(w1.astype(jnp.bfloat16))
    b1p = jnp.zeros((1, H_p), jnp.float32).at[:, :H].set(b1.astype(jnp.float32))
    w2p = jnp.zeros((H_p, Cout_p), jnp.bfloat16).at[:H, :Cout].set(w2.astype(jnp.bfloat16))
    b2p = jnp.zeros((1, Cout_p), jnp.float32).at[:, :Cout].set(b2.astype(jnp.float32))

    return dict(w1=w1p, b1=b1p, w2=w2p, b2=b2p,
                dims=(Cin, H, Cout), tile_h=tile_h)


def mlp_forward(x, params, out_dtype=jnp.float32):
    """x: [N, Cin]; params from prepare_params()."""
    Cin, H, Cout = params["dims"]
    tile_h = params["tile_h"]
    w1p, b1p, w2p, b2p = params["w1"], params["b1"], params["w2"], params["b2"]
    Cin_p, H_p = w1p.shape
    Cout_p = w2p.shape[1]

    N = x.shape[0]
    tile_n = min(TILE_N_MAX, _round_up(N, SUBLANE_BF16))
    N_p = _round_up(N, tile_n)

    # Pad / cast activations only when actually needed.
    if (N_p, Cin_p) != (N, Cin) or x.dtype != jnp.bfloat16:
        xp = jnp.zeros((N_p, Cin_p), jnp.bfloat16).at[:N, :Cin].set(
            x.astype(jnp.bfloat16))
    else:
        xp = x

    n_i = N_p // tile_n
    n_h = H_p // tile_h
    grid = (n_i, n_h)

    # Constant-index specs are never re-fetched -> single buffer; streamed
    # (hidden-dim varying) specs keep the default double buffer.
    resident = pl.Buffered(1)
    streamed = pl.Buffered(2)
    w_mode = resident if n_h == 1 else streamed
    w_bufs = 1 if n_h == 1 else 2

    # Explicit scoped-VMEM budget (bytes): buffered blocks + accumulator +
    # intermediate headroom.
    def _blk(rows, cols, itemsize, bufs):
        return _round_up(rows, 8) * _round_up(cols, LANE) * itemsize * bufs

    out_isize = jnp.dtype(out_dtype).itemsize
    vmem_bytes = (
        _blk(tile_n, Cin_p, 2, 2)            # x tile (bf16, double-buffered)
        + _blk(Cin_p, tile_h, 2, w_bufs)     # W1 block
        + _blk(1, tile_h, 4, w_bufs)         # b1 block
        + _blk(tile_h, Cout_p, 2, w_bufs)    # W2 block
        + _blk(1, Cout_p, 4, 1)              # b2 (resident)
        + _blk(tile_n, Cout_p, out_isize, 2) # out tile (double-buffered)
        + _blk(tile_n, Cout_p, 4, 1)         # f32 accumulator scratch
        + _blk(tile_n, tile_h, 4, 2)         # h intermediate headroom
    )
    vmem_limit = max(32 << 20, min(int(vmem_bytes * 1.25) + (2 << 20), 100 << 20))

    out = pl.pallas_call(
        mlp_kernel,
        out_shape=jax.ShapeDtypeStruct((N_p, Cout_p), out_dtype),
        grid=grid,
        in_specs=[
            # Activations: tiled over rows, resident across the h sweep.
            pl.BlockSpec((tile_n, Cin_p), lambda i, h: (i, 0)),
            # W1 columns / b1: streamed over the hidden axis.
            pl.BlockSpec((Cin_p, tile_h), lambda i, h: (0, h), pipeline_mode=w_mode),
            pl.BlockSpec((1, tile_h), lambda i, h: (0, h), pipeline_mode=w_mode),
            # W2 rows: streamed over the hidden axis.
            pl.BlockSpec((tile_h, Cout_p), lambda i, h: (h, 0), pipeline_mode=w_mode),
            # b2: constant block -> single-buffered resident.
            pl.BlockSpec((1, Cout_p), lambda i, h: (0, 0), pipeline_mode=resident),
        ],
        out_specs=pl.BlockSpec((tile_n, Cout_p), lambda i, h: (i, 0)),
        scratch_shapes=[pltpu.VMEM((tile_n, Cout_p), jnp.float32)],
        compiler_params=pltpu.CompilerParams(
            dimension_semantics=("parallel", "arbitrary"),
            vmem_limit_bytes=vmem_limit,
        ),
    )(xp, w1p, b1p, w2p, b2p)

    if (N_p, Cout_p) != (N, Cout):
        out = out[:N, :Cout]
    return out


def xavier_uniform(key, fan_in, fan_out):
    # torch.nn.init.xavier_uniform_ : U(-a, a), a = sqrt(6 / (fan_in + fan_out))
    a = (6.0 / (fan_in + fan_out)) ** 0.5
    return jax.random.uniform(key, (fan_in, fan_out), jnp.float32, -a, a)


def linear_bias(key, fan_in, fan_out):
    # torch.nn.Linear default bias init: U(-1/sqrt(fan_in), 1/sqrt(fan_in))
    bound = 1.0 / (fan_in ** 0.5)
    return jax.random.uniform(key, (1, fan_out), jnp.float32, -bound, bound)


if __name__ == "__main__":
    # Small shapes consistent with the module: N=8 rows, in=16, hidden=32, out=8
    N, IN_C, HID_C, OUT_C = 8, 16, 32, 8

    key = jax.random.PRNGKey(0)
    kx, kw1, kb1, kw2, kb2 = jax.random.split(key, 5)

    x = jax.random.normal(kx, (N, IN_C), jnp.float32)
    w1 = xavier_uniform(kw1, IN_C, HID_C)   # stored as [in, hidden] (= W1^T)
    b1 = linear_bias(kb1, IN_C, HID_C)
    w2 = xavier_uniform(kw2, HID_C, OUT_C)  # stored as [hidden, out] (= W2^T)
    b2 = linear_bias(kb2, HID_C, OUT_C)

    params = prepare_params(w1, b1, w2, b2)   # pad + bf16 cast once, reused per call
    out = mlp_forward(x, params)
    jax.block_until_ready(out)

    # Reference check: mirror the kernel's bf16-input / f32-accumulate path.
    xb = x.astype(jnp.bfloat16).astype(jnp.float32)
    w1b = w1.astype(jnp.bfloat16).astype(jnp.float32)
    w2b = w2.astype(jnp.bfloat16).astype(jnp.float32)
    h_ref = xb @ w1b + b1
    h_ref = h_ref.astype(jnp.bfloat16).astype(jnp.float32)
    ref = h_ref @ w2b + b2

    assert out.shape == (N, OUT_C)
    assert jnp.allclose(out, ref, atol=1e-2, rtol=1e-2), (
        float(jnp.max(jnp.abs(out - ref))))

    print("KERNEL_OK")
</pallas_src>

<mosaic_0001>
module attributes {stable_mosaic.version = 11 : i64} {
  func.func @mlp_kernel(%arg0: i32, %arg1: i32, %arg2: memref<16x128xbf16, #tpu.memory_space<vmem>>, %arg3: memref<128x128xbf16, #tpu.memory_space<vmem>>, %arg4: memref<1x128xf32, #tpu.memory_space<vmem>>, %arg5: memref<128x128xbf16, #tpu.memory_space<vmem>>, %arg6: memref<1x128xf32, #tpu.memory_space<vmem>>, %arg7: memref<16x128xf32, #tpu.memory_space<vmem>>, %arg8: memref<16x128xf32, #tpu.memory_space<vmem>>) attributes {dimension_semantics = [#tpu.dimension_semantics<parallel>, #tpu.dimension_semantics<arbitrary>], iteration_bounds = array<i64: 1, 1>, scalar_prefetch = 0 : i64, scratch_operands = 1 : i64, tpu.core_type = #tpu.core_type<tc>, window_params = [{transform_indices = @transform_0, window_bounds = array<i64: 16, 128>}, {pipeline_mode = #tpu.pipeline_mode<synchronous>, transform_indices = @transform_1, window_bounds = array<i64: 128, 128>}, {pipeline_mode = #tpu.pipeline_mode<synchronous>, transform_indices = @transform_2, window_bounds = array<i64: 1, 128>}, {pipeline_mode = #tpu.pipeline_mode<synchronous>, transform_indices = @transform_3, window_bounds = array<i64: 128, 128>}, {pipeline_mode = #tpu.pipeline_mode<synchronous>, transform_indices = @transform_4, window_bounds = array<i64: 1, 128>}, {transform_indices = @transform_5, window_bounds = array<i64: 16, 128>}]} {
    %c0_i32 = arith.constant 0 : i32
    %0 = arith.cmpi eq, %arg1, %c0_i32 : i32
    %1 = arith.extui %0 : i1 to i32
    %c0_i32_0 = arith.constant 0 : i32
    %2 = arith.cmpi ne, %1, %c0_i32_0 : i32
    scf.if %2 {
      %cst_15 = arith.constant 0.000000e+00 : f32
      %18 = vector.broadcast %cst_15 : f32 to vector<16x128xf32>
      %c0_16 = arith.constant 0 : index
      %c0_17 = arith.constant 0 : index
      %19 = vector.load %arg8[%c0_16, %c0_17] : memref<16x128xf32, #tpu.memory_space<vmem>>, vector<16x128xf32>
      tpu.vector_store %arg8[%c0_16, %c0_17], %18 {strides = array<i32>} : memref<16x128xf32, #tpu.memory_space<vmem>>, vector<16x128xf32>,
    } else {
    }
    %c0 = arith.constant 0 : index
    %c0_1 = arith.constant 0 : index
    %3 = vector.load %arg2[%c0, %c0_1] : memref<16x128xbf16, #tpu.memory_space<vmem>>, vector<16x128xbf16>
    %c0_2 = arith.constant 0 : index
    %c0_3 = arith.constant 0 : index
    %4 = vector.load %arg3[%c0_2, %c0_3] : memref<128x128xbf16, #tpu.memory_space<vmem>>, vector<128x128xbf16>
    %cst = arith.constant dense<0.000000e+00> : vector<16x128xf32>
    %5 = tpu.matmul %3, %4, %cst {dimension_numbers = #tpu.dot_dimension_numbers<[1], [0], [0], [1], [0, 0, 1, 1], [], []>} : vector<16x128xbf16>, vector<128x128xbf16>, vector<16x128xf32> -> vector<16x128xf32>
    %c0_4 = arith.constant 0 : index
    %c0_5 = arith.constant 0 : index
    %6 = vector.load %arg4[%c0_4, %c0_5] : memref<1x128xf32, #tpu.memory_space<vmem>>, vector<1x128xf32>
    %7 = vector.broadcast %6 : vector<1x128xf32> to vector<16x128xf32>
    %8 = arith.addf %5, %7 : vector<16x128xf32>
    %9 = arith.truncf %8 : vector<16x128xf32> to vector<16x128xbf16>
    %c0_6 = arith.constant 0 : index
    %c0_7 = arith.constant 0 : index
    %10 = vector.load %arg8[%c0_6, %c0_7] : memref<16x128xf32, #tpu.memory_space<vmem>>, vector<16x128xf32>
    %c0_8 = arith.constant 0 : index
    %c0_9 = arith.constant 0 : index
    %11 = vector.load %arg5[%c0_8, %c0_9] : memref<128x128xbf16, #tpu.memory_space<vmem>>, vector<128x128xbf16>
    %cst_10 = arith.constant dense<0.000000e+00> : vector<16x128xf32>
    %12 = tpu.matmul %9, %11, %cst_10 {dimension_numbers = #tpu.dot_dimension_numbers<[1], [0], [0], [1], [0, 0, 1, 1], [], []>} : vector<16x128xbf16>, vector<128x128xbf16>, vector<16x128xf32> -> vector<16x128xf32>
    %13 = arith.addf %10, %12 : vector<16x128xf32>
    %c0_11 = arith.constant 0 : index
    %c0_12 = arith.constant 0 : index
    %14 = vector.load %arg8[%c0_11, %c0_12] : memref<16x128xf32, #tpu.memory_space<vmem>>, vector<16x128xf32>
    tpu.vector_store %arg8[%c0_11, %c0_12], %13 {strides = array<i32>} : memref<16x128xf32, #tpu.memory_space<vmem>>, vector<16x128xf32>,
    %c0_i32_13 = arith.constant 0 : i32
    %15 = arith.cmpi eq, %arg1, %c0_i32_13 : i32
    %16 = arith.extui %15 : i1 to i32
    %c0_i32_14 = arith.constant 0 : i32
    %17 = arith.cmpi ne, %16, %c0_i32_14 : i32
    scf.if %17 {
      %c0_15 = arith.constant 0 : index
      %c0_16 = arith.constant 0 : index
      %18 = vector.load %arg8[%c0_15, %c0_16] : memref<16x128xf32, #tpu.memory_space<vmem>>, vector<16x128xf32>
      %c0_17 = arith.constant 0 : index
      %c0_18 = arith.constant 0 : index
      %19 = vector.load %arg6[%c0_17, %c0_18] : memref<1x128xf32, #tpu.memory_space<vmem>>, vector<1x128xf32>
      %20 = vector.broadcast %19 : vector<1x128xf32> to vector<16x128xf32>
      %21 = arith.addf %18, %20 : vector<16x128xf32>
      %c0_19 = arith.constant 0 : index
      %c0_20 = arith.constant 0 : index
      %22 = vector.load %arg7[%c0_19, %c0_20] : memref<16x128xf32, #tpu.memory_space<vmem>>, vector<16x128xf32>
      tpu.vector_store %arg7[%c0_19, %c0_20], %21 {strides = array<i32>} : memref<16x128xf32, #tpu.memory_space<vmem>>, vector<16x128xf32>,
    } else {
    }
    return
  }
  func.func @transform_0(%arg0: i32, %arg1: i32) -> (i32, i32) {
    %c0_i32 = arith.constant 0 : i32
    %c0_i32_0 = arith.constant 0 : i32
    return %arg0, %c0_i32 : i32, i32
  }
  func.func @transform_1(%arg0: i32, %arg1: i32) -> (i32, i32) {
    %c0_i32 = arith.constant 0 : i32
    %c0_i32_0 = arith.constant 0 : i32
    return %c0_i32, %arg1 : i32, i32
  }
  func.func @transform_2(%arg0: i32, %arg1: i32) -> (i32, i32) {
    %c0_i32 = arith.constant 0 : i32
    %c0_i32_0 = arith.constant 0 : i32
    return %c0_i32, %arg1 : i32, i32
  }
  func.func @transform_3(%arg0: i32, %arg1: i32) -> (i32, i32) {
    %c0_i32 = arith.constant 0 : i32
    %c0_i32_0 = arith.constant 0 : i32
    return %arg1, %c0_i32 : i32, i32
  }
  func.func @transform_4(%arg0: i32, %arg1: i32) -> (i32, i32) {
    %c0_i32 = arith.constant 0 : i32
    %c0_i32_0 = arith.constant 0 : i32
    %c0_i32_1 = arith.constant 0 : i32
    return %c0_i32, %c0_i32_0 : i32, i32
  }
  func.func @transform_5(%arg0: i32, %arg1: i32) -> (i32, i32) {
    %c0_i32 = arith.constant 0 : i32
    %c0_i32_0 = arith.constant 0 : i32
    return %arg0, %c0_i32 : i32, i32
  }
}

</mosaic_0001>

<bundles_post_ra>
// kernel: tpu_custom_call.1
= control target key start
LH: loop header
LB: loop body
LE: loop exit
PB: predicated region body
PF: predicated region fallthrough
CT: control target
= control target key end

     0   :  { %10 = vsyncpa [#allocation4], 0  ;;  %s535_s0 = inlined_call_operand.hbm [shape: bf16[16,128], index: 0, kind: input, shape index: {}]   ;;  %s536_s1 = inlined_call_operand.hbm [shape: bf16[128,128], index: 1, kind: input, shape index: {}]   ;;  %s537_s2 = inlined_call_operand.vmem [shape: f32[1,128], index: 2, kind: input, shape index: {}]   ;;  %s538_s3 = inlined_call_operand.hbm [shape: bf16[128,128], index: 3, kind: input, shape index: {}]   ;;  %s539_s4 = inlined_call_operand.vmem [shape: f32[1,128], index: 4, kind: input, shape index: {}]   ;;  %s540_s5 = inlined_call_operand.hbm [shape: f32[16,128], index: 5, kind: output, shape index: {}]  }
   0x1   :  { %11 = vsyncpa [#allocation7], 0 }
   0x2   :  { %12 = vsyncpa [#allocation5], 0  ;;  %s30_s20 = sshll.u32 %s536_s1, 4  ;;  %s479_s21 = smov [#allocation6]   ;;  %s31_s20 = int_to_ptr.hbm [resolvable:$true] %s30_s20 }
   0x3   :  { %s32_s22 = sshll.u32 %s479_s21, 4  ;;  %s17_s25 = sshll.u32 %s535_s0, 4  ;;  %s33_s22 = int_to_ptr.vmem [resolvable:$true] %s32_s22  ;;  %s18_s25 = int_to_ptr.hbm [resolvable:$true] %s17_s25 }
   0x4   :  { %s480_s26 = smov 64   ;;  %s481_s27 = smov 4  }
   0x5   :  { %38 = dma.hbm_to_vmem [thread:$0]  %s31_s20, 1024, %s33_s22, [#allocation7], %s480_s26, %s480_s26, %s481_s27  }
   0x6   :  { %s482_s28 = smov [#allocation3]   ;;  %s45_s7 = sshll.u32 %s538_s3, 4  ;;  %s46_s7 = int_to_ptr.hbm [resolvable:$true] %s45_s7 }
   0x7   :  { %s19_s29 = sshll.u32 %s482_s28, 4  ;;  %s483_s1 = smov [#allocation8]   ;;  %s20_s29 = int_to_ptr.vmem [resolvable:$true] %s19_s29 }
   0x8   :  { %25 = dma.hbm_to_vmem [thread:$0]  %s18_s25, 128, %s20_s29, [#allocation4], %s480_s26, %s480_s26, %s481_s27  }
   0x9   :  { %s47_s8 = sshll.u32 %s483_s1, 4  ;;  %s48_s8 = int_to_ptr.vmem [resolvable:$true] %s47_s8 }
   0xa   :  { %53 = dma.hbm_to_vmem [thread:$0]  %s46_s7, 1024, %s48_s8, [#allocation7], %s480_s26, %s480_s26, %s481_s27  }
   0xb   :  { %473 = dma.done.wait [#allocation4], 128  }
   0xc   :  { %474 = vsyncadd [#allocation4], 4294967168 }
   0xd   :  { %475 = dma.done.wait [#allocation7], 2048  }
   0xe   :  { %476 = vsyncadd [#allocation7], 4294965248  ;;  %v358_v0 = vld [vmem:[#allocation6 + $0x38] sm:$0xff]  ;;  %v357_v1 = vld [vmem:[#allocation6 + $0x30] sm:$0xff]  ;;  %s484_s11 = smov [#allocation9]   ;;  %s268_s15 = sshll.u32 %s540_s5, 4  ;;  %s269_s15 = int_to_ptr.hbm [resolvable:$true] %s268_s15 }
   0xf   :  { %150 = vmatpush.bf16.msra.mxu0 %v358_v0  ;;  %v366_v2 = vld [vmem:[#allocation8 + $0x38] sm:$0xff]  ;;  %v365_v3 = vld [vmem:[#allocation8 + $0x30] sm:$0xff]  ;;  %v356_v4 = vld [vmem:[#allocation6 + $0x28] sm:$0xff]  ;;  %s266_s12 = sshll.u32 %s484_s11, 4  ;;  %s486_s16 = smov 8   ;;  %s267_s12 = int_to_ptr.vmem [resolvable:$true] %s266_s12 }
  0x10   :  { %231 = vmatpush.bf16.msra.mxu1 %v366_v2  ;;  %v364_v5 = vld [vmem:[#allocation8 + $0x28] sm:$0xff]  ;;  %v355_v6 = vld [vmem:[#allocation6 + $0x20] sm:$0xff]  ;;  %v354_v8 = vld [vmem:[#allocation6 + $0x18] sm:$0xff] }
  0x11   :  { %v363_v7 = vld [vmem:[#allocation8 + $0x20] sm:$0xff]  ;;  %v362_v9 = vld [vmem:[#allocation8 + $0x18] sm:$0xff]  ;;  %v353_v10 = vld [vmem:[#allocation6 + $0x10] sm:$0xff] }
  0x12   :  { %v352_v11 = vld [vmem:[#allocation6 + $0x8] sm:$0xff]  ;;  %v351_v12 = vld [vmem:[#allocation6] sm:$0xff]  ;;  %v350_v13 = vld [vmem:[#allocation3] sm:$0xff] }
  0x13   :  { %151 = vmatpush.bf16.msra.mxu0 %v357_v1  ;;  %v361_v14 = vld [vmem:[#allocation8 + $0x10] sm:$0xff]  ;;  %v360_v15 = vld [vmem:[#allocation8 + $0x8] sm:$0xff]  ;;  %v359_v16 = vld [vmem:[#allocation8] sm:$0xff] }
  0x14   :  { %232 = vmatpush.bf16.msra.mxu1 %v365_v3  ;;  %v375_v18 = vld [vmem:[%s537_s2] ss:$0 sm:$0xff]  ;;  %s485_s2 = smov 128  }
  0x15   :  { %v376_v23 = vld [vmem:[%s539_s4] ss:$0 sm:$0xff] }
  0x17   :  { %152 = vmatpush.bf16.msra.mxu0 %v356_v4 }
  0x18   :  { %233 = vmatpush.bf16.msra.mxu1 %v364_v5 }
  0x1b   :  { %153 = vmatpush.bf16.msra.mxu0 %v355_v6 }
  0x1c   :  { %234 = vmatpush.bf16.msra.mxu1 %v363_v7 }
  0x1f   :  { %154 = vmatpush.bf16.msra.mxu0 %v354_v8 }
  0x20   :  { %235 = vmatpush.bf16.msra.mxu1 %v362_v9 }
  0x23   :  { %155 = vmatpush.bf16.msra.mxu0 %v353_v10 }
  0x24   :  { %236 = vmatpush.bf16.msra.mxu1 %v361_v14 }
  0x27   :  { %156 = vmatpush.bf16.msra.mxu0 %v352_v11 }
  0x28   :  { %237 = vmatpush.bf16.msra.mxu1 %v360_v15 }
  0x2b   :  { %157 = vmatpush.bf16.msra.mxu0 %v351_v12 }
  0x2c   :  { %238 = vmatpush.bf16.msra.mxu1 %v359_v16 }
  0x2e   :  { %158 = vmatmul.bf16.vlgmr.msra.gmra.mxu0 %v350_v13 }
  0xab   :  { %v159_v17 = vpop.f32.mrf.mxu0 }
  0xac   :  { %v160_v20 = vadd.f32 %v375_v18, %v159_v17 }
  0xb3   :  { %v161_v19 = vpop.f32.mrf.mxu0 }
  0xb4   :  { %v162_v21 = vadd.f32 %v375_v18, %v161_v19 }
  0xb6   :  { %v164_v22 = vpack.c.bf16 %v162_v21, %v160_v20 }
  0xb8   :  { %239 = vmatmul.bf16.vlgmr.msra.gmra.mxu1 %v164_v22 }
 0x135   :  { %v240_v24 = vpop.f32.mrf.mxu1 }
 0x136   :  { %v258_v25 = vadd.f32 %v376_v23, %v240_v24 }
 0x138   :  { %260 = vst [vmem:[#allocation9] sm:$0xff] %v258_v25 }
 0x13d   :  { %v242_v26 = vpop.f32.mrf.mxu1 }
 0x13e   :  { %v259_v27 = vadd.f32 %v376_v23, %v242_v26 }
 0x140   :  { %261 = vst [vmem:[#allocation9 + $0x8] sm:$0xff] %v259_v27 }
 0x141   :  { %274 = dma.vmem_to_hbm [thread:$0]  %s267_s12, 256, %s269_s15, [#allocation5], %s485_s2, %s485_s2, %s486_s16  }
 0x142   :  { %477 = dma.done.wait [#allocation5], 256  }
 0x143   :  { %478 = vsyncadd [#allocation5], 4294967040 }
 0x144   :  { %279 = vsyncpa [#allocation4], 1 }
 0x145   :  { %280 = vsyncpa [#allocation7], 1 }
 0x146   :  { %281 = vsyncpa [#allocation5], 1 }

</bundles_post_ra>
